<compile_context>
chip_gen: v7x
topology: tpu7x:2x2x1
jax: 0.10.0
libtpu: 0.0.40
codegen_flags: <defaults>
</compile_context>

<pallas_src>
import numpy as np
import jax
import jax.numpy as jnp
from jax.experimental import pallas as pl
from jax.experimental.pallas import tpu as pltpu


def _lowest(dtype):
    """Identity element for max in `dtype` (mmcv inits non-empty bins to
    -FLT_MAX; finfo/iinfo min also works for integer feature maps)."""
    if jnp.issubdtype(dtype, jnp.floating):
        return float(jnp.finfo(dtype).min)
    return int(jnp.iinfo(dtype).min)


def _roi_pool_kernel(bidx_ref, bx1_ref, bx2_ref, by1_ref, by2_ref,
                     x_ref, out_ref, colmax_ref):
    """One grid step == one RoI.

    x_ref is the (1, H, W, C) feature-map slice of the RoI's batch element
    (data-dependent block index via scalar-prefetched batch indices; RoIs are
    pre-sorted by batch so the block is usually resident).
    colmax_ref is a (pooled_h, W, C) VMEM scratch.
    """
    i = pl.program_id(0)
    _, height, width, channels = x_ref.shape
    _, pooled_h, pooled_w, _ = out_ref.shape
    dtype = x_ref.dtype
    neg = _lowest(dtype)

    # ---- Stage 1: per pooled row, running max over the bin's H rows. ----
    # H is the cheap axis (vreg-wise max, VALU only); the loop covers exactly
    # [y1, y2), so work is proportional to the RoI bbox, not the full map.
    for ph in range(pooled_h):
        y1 = by1_ref[i * pooled_h + ph]
        y2 = by2_ref[i * pooled_h + ph]
        colmax_ref[ph] = jnp.full((width, channels), neg, dtype)

        def h_body(hh, carry, _ph=ph):
            colmax_ref[_ph] = jnp.maximum(colmax_ref[_ph], x_ref[0, hh])
            return carry

        jax.lax.fori_loop(y1, y2, h_body, 0)   # zero iterations if y2 <= y1

    # ---- Stage 2: per bin, masked cross-sublane (W) reduce of the small ----
    # (pooled_h, W, C) intermediate only.
    w_pos = jax.lax.broadcasted_iota(jnp.int32, (width, 1), 0)       # (W, 1)
    for ph in range(pooled_h):
        y1 = by1_ref[i * pooled_h + ph]
        y2 = by2_ref[i * pooled_h + ph]
        vals = []
        for pw in range(pooled_w):
            x1 = bx1_ref[i * pooled_w + pw]
            x2 = bx2_ref[i * pooled_w + pw]
            wmask = (w_pos >= x1) & (w_pos < x2)                     # (W, 1)
            val = jnp.max(jnp.where(wmask, colmax_ref[ph], neg),
                          axis=0, keepdims=True)                     # (1, C)
            # mmcv: "an empty pooling region is defined to be zero"
            is_empty = jnp.logical_or(x2 <= x1, y2 <= y1)
            vals.append(jnp.where(is_empty, jnp.zeros_like(val), val))
        out_ref[0, ph] = jnp.concatenate(vals, axis=0).astype(out_ref.dtype)


def roi_pool_nhwc(x_nhwc, rois, output_size, spatial_scale=1.0):
    """input: (N, H, W, C); rois: (num_rois, 5) = (batch_idx, x1, y1, x2, y2).
    Returns (num_rois, pooled_h, pooled_w, C)."""
    pooled_h, pooled_w = output_size
    n, h, w, c = x_nhwc.shape
    num_rois, roi_cols = rois.shape
    assert roi_cols == 5, 'RoI must be (idx, x1, y1, x2, y2)!'

    rois = rois.astype(jnp.float32)

    # Sort RoIs by batch index so consecutive grid steps map to the same input
    # block index and Pallas can skip re-DMAing the (1, H, W, C) slice.
    # TODO(synk): verify in an xprof trace that repeated data-dependent block
    # indices elide the re-DMA; if not, switch to memory_space=pl.ANY and a
    # manual make_async_copy gated on pl.when(bidx changes).
    batch_idx = rois[:, 0].astype(jnp.int32)
    order = jnp.argsort(batch_idx)
    inv_order = jnp.argsort(order)
    rois_s = rois[order]
    bidx_s = batch_idx[order]

    # Precompute integer bin boundaries (mmcv CUDA semantics, f32 arithmetic);
    # passed as flat int32 scalar-prefetch arrays (SMEM, no 2-D padding bloat).
    scale = jnp.float32(spatial_scale)
    roi_x1 = rois_s[:, 1] * scale
    roi_y1 = rois_s[:, 2] * scale
    roi_x2 = (rois_s[:, 3] + jnp.float32(1.0)) * scale
    roi_y2 = (rois_s[:, 4] + jnp.float32(1.0)) * scale
    roi_w = jnp.maximum(roi_x2 - roi_x1, jnp.float32(1.0))
    roi_h = jnp.maximum(roi_y2 - roi_y1, jnp.float32(1.0))
    bsw = roi_w / jnp.float32(pooled_w)
    bsh = roi_h / jnp.float32(pooled_h)
    pw_i = jnp.arange(pooled_w, dtype=jnp.float32)
    ph_i = jnp.arange(pooled_h, dtype=jnp.float32)

    def _clip_i32(v, hi):
        return jnp.clip(v.astype(jnp.int32), 0, hi)

    bx1 = _clip_i32(jnp.floor(pw_i[None, :] * bsw[:, None] + roi_x1[:, None]), w)
    bx2 = _clip_i32(jnp.ceil((pw_i[None, :] + 1.0) * bsw[:, None] + roi_x1[:, None]), w)
    by1 = _clip_i32(jnp.floor(ph_i[None, :] * bsh[:, None] + roi_y1[:, None]), h)
    by2 = _clip_i32(jnp.ceil((ph_i[None, :] + 1.0) * bsh[:, None] + roi_y1[:, None]), h)
    bx1, bx2 = bx1.reshape(-1), bx2.reshape(-1)      # index: i * pooled_w + pw
    by1, by2 = by1.reshape(-1), by2.reshape(-1)      # index: i * pooled_h + ph

    # ---- Generation-aware VMEM budgeting ----
    itemsize = jnp.dtype(x_nhwc.dtype).itemsize
    block_bytes = h * w * c * itemsize
    scratch_bytes = pooled_h * w * c * itemsize
    out_block_bytes = pooled_h * pooled_w * c * itemsize
    try:
        vmem_cap = int(pltpu.get_tpu_info().vmem_capacity_bytes)
    except Exception:
        vmem_cap = 64 << 20          # conservative: v7x has 64 MiB per TC
    headroom = 8 << 20
    slack = 4 << 20
    need_double = 2 * block_bytes + scratch_bytes + 2 * out_block_bytes + slack
    single_buffer_input = need_double > (vmem_cap - headroom)
    need = ((block_bytes if single_buffer_input else 2 * block_bytes)
            + scratch_bytes + 2 * out_block_bytes + slack)
    vmem_limit = int(min(max(need, 32 << 20), vmem_cap - headroom))
    # TODO(synk): maps too large to be resident even single-buffered (stride-4
    # FPN levels on v7x) need an H-tiling grid axis with a running-max scratch,
    # or bbox-only manual DMA (memory_space=pl.ANY + make_async_copy of the
    # [y1, y2) rows only). Also consider batching R>1 RoIs per grid step for
    # tiny maps to amortize the ~0.35 us/step overhead.

    def _input_spec():
        shape = (1, h, w, c)
        imap = lambda i, bidx, bx1, bx2, by1, by2: (bidx[i], 0, 0, 0)
        if single_buffer_input:
            try:
                # The feature-map block is resident across batch-sorted RoIs;
                # double-buffering a large map is pure VMEM waste.
                return pl.BlockSpec(shape, imap, pipeline_mode=pl.Buffered(1))
            except Exception:
                pass
        return pl.BlockSpec(shape, imap)

    out_sorted = pl.pallas_call(
        _roi_pool_kernel,
        out_shape=jax.ShapeDtypeStruct((num_rois, pooled_h, pooled_w, c),
                                       x_nhwc.dtype),
        grid_spec=pltpu.PrefetchScalarGridSpec(
            num_scalar_prefetch=5,           # bidx, bx1, bx2, by1, by2 -> SMEM
            grid=(num_rois,),
            in_specs=[_input_spec()],
            out_specs=pl.BlockSpec((1, pooled_h, pooled_w, c),
                                   lambda i, bidx, bx1, bx2, by1, by2:
                                   (i, 0, 0, 0)),
            scratch_shapes=[pltpu.VMEM((pooled_h, w, c), x_nhwc.dtype)],
        ),
        compiler_params=pltpu.CompilerParams(
            dimension_semantics=("parallel",),   # RoIs independent -> megacore
            vmem_limit_bytes=vmem_limit),
    )(bidx_s, bx1, bx2, by1, by2, x_nhwc)

    return out_sorted[inv_order]                 # undo the batch sort


def roi_pool(x_nchw, rois, output_size, spatial_scale=1.0):
    """PyTorch-compatible entry point.
    input: (N, C, H, W); returns (num_rois, C, pooled_h, pooled_w).
    NOTE: the NCHW->NHWC transpose is a full HBM round trip of the feature
    map; producers that can emit NHWC should call roi_pool_nhwc directly."""
    x_nhwc = jnp.transpose(x_nchw, (0, 2, 3, 1))
    out_nhwc = roi_pool_nhwc(x_nhwc, rois, output_size, spatial_scale)
    return jnp.transpose(out_nhwc, (0, 3, 1, 2))


class RoIPool:
    """JAX/Pallas equivalent of mmcv.ops.RoIPool (forward only, no params)."""

    def __init__(self, output_size, spatial_scale=1.0):
        if isinstance(output_size, int):
            output_size = (output_size, output_size)
        self.output_size = tuple(output_size)
        self.spatial_scale = float(spatial_scale)

    def __call__(self, input, rois):
        return roi_pool(input, rois, self.output_size, self.spatial_scale)

    def __repr__(self):
        return (f'{self.__class__.__name__}(output_size={self.output_size}, '
                f'spatial_scale={self.spatial_scale})')


# TODO(synk): backward / argmax bookkeeping of RoIPoolFunction is not implemented
# (forward-only kernel; argmax is never exposed by the module's forward anyway).


def roi_pool_reference(x_nchw, rois, output_size, spatial_scale):
    """Pure NumPy reference mirroring the mmcv CUDA kernel (f32 arithmetic)."""
    x = np.asarray(x_nchw)
    r = np.asarray(rois, dtype=np.float32)
    ph_n, pw_n = output_size
    _, c, h, w = x.shape
    scale = np.float32(spatial_scale)
    out = np.zeros((r.shape[0], c, ph_n, pw_n), dtype=x.dtype)
    for i in range(r.shape[0]):
        b = int(r[i, 0])
        roi_x1 = r[i, 1] * scale
        roi_y1 = r[i, 2] * scale
        roi_x2 = (r[i, 3] + np.float32(1.0)) * scale
        roi_y2 = (r[i, 4] + np.float32(1.0)) * scale
        roi_w = max(roi_x2 - roi_x1, np.float32(1.0))
        roi_h = max(roi_y2 - roi_y1, np.float32(1.0))
        bsw = roi_w / np.float32(pw_n)
        bsh = roi_h / np.float32(ph_n)
        for ph in range(ph_n):
            for pw in range(pw_n):
                x1 = int(np.floor(np.float32(pw) * bsw + roi_x1))
                y1 = int(np.floor(np.float32(ph) * bsh + roi_y1))
                x2 = int(np.ceil(np.float32(pw + 1) * bsw + roi_x1))
                y2 = int(np.ceil(np.float32(ph + 1) * bsh + roi_y1))
                x1 = min(max(x1, 0), w)
                x2 = min(max(x2, 0), w)
                y1 = min(max(y1, 0), h)
                y2 = min(max(y2, 0), h)
                if y2 <= y1 or x2 <= x1:
                    out[i, :, ph, pw] = 0
                else:
                    out[i, :, ph, pw] = x[b, :, y1:y2, x1:x2].max(axis=(1, 2))
    return out


if __name__ == "__main__":
    key = jax.random.PRNGKey(0)
    n, c, h, w = 2, 4, 16, 16
    output_size = (2, 2)
    spatial_scale = 0.5   # rois are in the original image scale (32x32)

    x = jax.random.normal(key, (n, c, h, w), dtype=jnp.float32)
    rois = jnp.array([
        [0.0,  2.3,  3.1, 20.4, 18.9],
        [1.0,  0.0,  0.0, 30.7, 30.7],
        [0.0, 10.5, 12.2, 25.7, 29.9],
        [1.0,  5.1,  7.3,  9.6, 11.8],
    ], dtype=jnp.float32)

    pool = RoIPool(output_size=output_size, spatial_scale=spatial_scale)
    out = jax.block_until_ready(pool(x, rois))

    ref = roi_pool_reference(np.asarray(x), np.asarray(rois),
                             output_size, spatial_scale)
    np.testing.assert_allclose(np.asarray(out), ref, rtol=1e-5, atol=1e-5)
    print("KERNEL_OK")
</pallas_src>

<mosaic_0001>
module attributes {stable_mosaic.version = 11 : i64} {
  func.func @_roi_pool_kernel(%arg0: i32, %arg1: memref<4xi32, #tpu.memory_space<smem>>, %arg2: memref<8xi32, #tpu.memory_space<smem>>, %arg3: memref<8xi32, #tpu.memory_space<smem>>, %arg4: memref<8xi32, #tpu.memory_space<smem>>, %arg5: memref<8xi32, #tpu.memory_space<smem>>, %arg6: memref<1x16x16x4xf32, #tpu.memory_space<vmem>>, %arg7: memref<1x2x2x4xf32, #tpu.memory_space<vmem>>, %arg8: memref<2x16x4xf32, #tpu.memory_space<vmem>>) attributes {dimension_semantics = [#tpu.dimension_semantics<parallel>], iteration_bounds = array<i64: 4>, scalar_prefetch = 5 : i64, scratch_operands = 1 : i64, tpu.core_type = #tpu.core_type<tc>, window_params = [{transform_indices = @transform_0, window_bounds = array<i64: 1, 16, 16, 4>}, {transform_indices = @transform_1, window_bounds = array<i64: 1, 2, 2, 4>}]} {
    %c2_i32 = arith.constant 2 : i32
    %0 = arith.muli %arg0, %c2_i32 : i32
    %c0_i32 = arith.constant 0 : i32
    %1 = arith.addi %0, %c0_i32 : i32
    %2 = arith.index_cast %1 : i32 to index
    %3 = memref.load %arg4[%2] : memref<8xi32, #tpu.memory_space<smem>>
    %c2_i32_0 = arith.constant 2 : i32
    %4 = arith.muli %arg0, %c2_i32_0 : i32
    %c0_i32_1 = arith.constant 0 : i32
    %5 = arith.addi %4, %c0_i32_1 : i32
    %6 = arith.index_cast %5 : i32 to index
    %7 = memref.load %arg5[%6] : memref<8xi32, #tpu.memory_space<smem>>
    %cst = arith.constant -3.40282347E+38 : f32
    %8 = vector.broadcast %cst : f32 to vector<16x4xf32>
    %c0 = arith.constant 0 : index
    %c0_2 = arith.constant 0 : index
    %c0_3 = arith.constant 0 : index
    %9 = vector.load %arg8[%c0, %c0_2, %c0_3] : memref<2x16x4xf32, #tpu.memory_space<vmem>>, vector<1x16x4xf32>
    %10 = vector.shape_cast %9 : vector<1x16x4xf32> to vector<16x4xf32>
    %11 = vector.shape_cast %8 : vector<16x4xf32> to vector<1x16x4xf32>
    tpu.vector_store %arg8[%c0, %c0_2, %c0_3], %11 {strides = array<i32>} : memref<2x16x4xf32, #tpu.memory_space<vmem>>, vector<1x16x4xf32>,
    %c0_i32_4 = arith.constant 0 : i32
    %12 = arith.subi %7, %3 : i32
    %13 = arith.addi %3, %12 : i32
    %c1_i32 = arith.constant 1 : i32
    scf.for %arg9 = %3 to %13 step %c1_i32  : i32 {
      %c0_70 = arith.constant 0 : index
      %c0_71 = arith.constant 0 : index
      %c0_72 = arith.constant 0 : index
      %157 = vector.load %arg8[%c0_70, %c0_71, %c0_72] : memref<2x16x4xf32, #tpu.memory_space<vmem>>, vector<1x16x4xf32>
      %158 = vector.shape_cast %157 : vector<1x16x4xf32> to vector<16x4xf32>
      %c0_73 = arith.constant 0 : index
      %159 = arith.index_cast %arg9 : i32 to index
      %c0_74 = arith.constant 0 : index
      %c0_75 = arith.constant 0 : index
      %160 = vector.load %arg6[%c0_73, %159, %c0_74, %c0_75] : memref<1x16x16x4xf32, #tpu.memory_space<vmem>>, vector<1x1x16x4xf32>
      %161 = vector.shape_cast %160 : vector<1x1x16x4xf32> to vector<16x4xf32>
      %162 = arith.maximumf %158, %161 : vector<16x4xf32>
      %c0_76 = arith.constant 0 : index
      %c0_77 = arith.constant 0 : index
      %c0_78 = arith.constant 0 : index
      %163 = vector.load %arg8[%c0_76, %c0_77, %c0_78] : memref<2x16x4xf32, #tpu.memory_space<vmem>>, vector<1x16x4xf32>
      %164 = vector.shape_cast %163 : vector<1x16x4xf32> to vector<16x4xf32>
      %165 = vector.shape_cast %162 : vector<16x4xf32> to vector<1x16x4xf32>
      tpu.vector_store %arg8[%c0_76, %c0_77, %c0_78], %165 {strides = array<i32>} : memref<2x16x4xf32, #tpu.memory_space<vmem>>, vector<1x16x4xf32>,
    }
    %c2_i32_5 = arith.constant 2 : i32
    %14 = arith.muli %arg0, %c2_i32_5 : i32
    %c1_i32_6 = arith.constant 1 : i32
    %15 = arith.addi %14, %c1_i32_6 : i32
    %16 = arith.index_cast %15 : i32 to index
    %17 = memref.load %arg4[%16] : memref<8xi32, #tpu.memory_space<smem>>
    %c2_i32_7 = arith.constant 2 : i32
    %18 = arith.muli %arg0, %c2_i32_7 : i32
    %c1_i32_8 = arith.constant 1 : i32
    %19 = arith.addi %18, %c1_i32_8 : i32
    %20 = arith.index_cast %19 : i32 to index
    %21 = memref.load %arg5[%20] : memref<8xi32, #tpu.memory_space<smem>>
    %cst_9 = arith.constant -3.40282347E+38 : f32
    %22 = vector.broadcast %cst_9 : f32 to vector<16x4xf32>
    %c1 = arith.constant 1 : index
    %c0_10 = arith.constant 0 : index
    %c0_11 = arith.constant 0 : index
    %23 = vector.load %arg8[%c1, %c0_10, %c0_11] : memref<2x16x4xf32, #tpu.memory_space<vmem>>, vector<1x16x4xf32>
    %24 = vector.shape_cast %23 : vector<1x16x4xf32> to vector<16x4xf32>
    %25 = vector.shape_cast %22 : vector<16x4xf32> to vector<1x16x4xf32>
    tpu.vector_store %arg8[%c1, %c0_10, %c0_11], %25 {strides = array<i32>} : memref<2x16x4xf32, #tpu.memory_space<vmem>>, vector<1x16x4xf32>,
    %c0_i32_12 = arith.constant 0 : i32
    %26 = arith.subi %21, %17 : i32
    %27 = arith.addi %17, %26 : i32
    %c1_i32_13 = arith.constant 1 : i32
    scf.for %arg9 = %17 to %27 step %c1_i32_13  : i32 {
      %c1_70 = arith.constant 1 : index
      %c0_71 = arith.constant 0 : index
      %c0_72 = arith.constant 0 : index
      %157 = vector.load %arg8[%c1_70, %c0_71, %c0_72] : memref<2x16x4xf32, #tpu.memory_space<vmem>>, vector<1x16x4xf32>
      %158 = vector.shape_cast %157 : vector<1x16x4xf32> to vector<16x4xf32>
      %c0_73 = arith.constant 0 : index
      %159 = arith.index_cast %arg9 : i32 to index
      %c0_74 = arith.constant 0 : index
      %c0_75 = arith.constant 0 : index
      %160 = vector.load %arg6[%c0_73, %159, %c0_74, %c0_75] : memref<1x16x16x4xf32, #tpu.memory_space<vmem>>, vector<1x1x16x4xf32>
      %161 = vector.shape_cast %160 : vector<1x1x16x4xf32> to vector<16x4xf32>
      %162 = arith.maximumf %158, %161 : vector<16x4xf32>
      %c1_76 = arith.constant 1 : index
      %c0_77 = arith.constant 0 : index
      %c0_78 = arith.constant 0 : index
      %163 = vector.load %arg8[%c1_76, %c0_77, %c0_78] : memref<2x16x4xf32, #tpu.memory_space<vmem>>, vector<1x16x4xf32>
      %164 = vector.shape_cast %163 : vector<1x16x4xf32> to vector<16x4xf32>
      %165 = vector.shape_cast %162 : vector<16x4xf32> to vector<1x16x4xf32>
      tpu.vector_store %arg8[%c1_76, %c0_77, %c0_78], %165 {strides = array<i32>} : memref<2x16x4xf32, #tpu.memory_space<vmem>>, vector<1x16x4xf32>,
    }
    %28 = tpu.iota {dimensions = array<i32: 0>} : vector<16x1xi32>
    %c2_i32_14 = arith.constant 2 : i32
    %29 = arith.muli %arg0, %c2_i32_14 : i32
    %c0_i32_15 = arith.constant 0 : i32
    %30 = arith.addi %29, %c0_i32_15 : i32
    %31 = arith.index_cast %30 : i32 to index
    %32 = memref.load %arg4[%31] : memref<8xi32, #tpu.memory_space<smem>>
    %c2_i32_16 = arith.constant 2 : i32
    %33 = arith.muli %arg0, %c2_i32_16 : i32
    %c0_i32_17 = arith.constant 0 : i32
    %34 = arith.addi %33, %c0_i32_17 : i32
    %35 = arith.index_cast %34 : i32 to index
    %36 = memref.load %arg5[%35] : memref<8xi32, #tpu.memory_space<smem>>
    %c2_i32_18 = arith.constant 2 : i32
    %37 = arith.muli %arg0, %c2_i32_18 : i32
    %c0_i32_19 = arith.constant 0 : i32
    %38 = arith.addi %37, %c0_i32_19 : i32
    %39 = arith.index_cast %38 : i32 to index
    %40 = memref.load %arg2[%39] : memref<8xi32, #tpu.memory_space<smem>>
    %c2_i32_20 = arith.constant 2 : i32
    %41 = arith.muli %arg0, %c2_i32_20 : i32
    %c0_i32_21 = arith.constant 0 : i32
    %42 = arith.addi %41, %c0_i32_21 : i32
    %43 = arith.index_cast %42 : i32 to index
    %44 = memref.load %arg3[%43] : memref<8xi32, #tpu.memory_space<smem>>
    %45 = vector.broadcast %40 : i32 to vector<16x1xi32>
    %46 = arith.cmpi sge, %28, %45 : vector<16x1xi32>
    %47 = vector.broadcast %44 : i32 to vector<16x1xi32>
    %48 = arith.cmpi slt, %28, %47 : vector<16x1xi32>
    %49 = arith.andi %46, %48 : vector<16x1xi1>
    %c0_22 = arith.constant 0 : index
    %c0_23 = arith.constant 0 : index
    %c0_24 = arith.constant 0 : index
    %50 = vector.load %arg8[%c0_22, %c0_23, %c0_24] : memref<2x16x4xf32, #tpu.memory_space<vmem>>, vector<1x16x4xf32>
    %51 = vector.shape_cast %50 : vector<1x16x4xf32> to vector<16x4xf32>
    %cst_25 = arith.constant -3.40282347E+38 : f32
    %52 = vector.shape_cast %49 : vector<16x1xi1> to vector<16x1xi1>
    %53 = vector.broadcast %52 : vector<16x1xi1> to vector<16x4xi1>
    %54 = vector.broadcast %cst_25 : f32 to vector<16x4xf32>
    %55 = arith.select %53, %51, %54 : vector<16x4xi1>, vector<16x4xf32>
    %cst_26 = arith.constant dense<0xFF800000> : vector<4xf32>
    %56 = vector.multi_reduction <maximumf>, %55, %cst_26 [0] : vector<16x4xf32> to vector<4xf32>
    %57 = vector.shape_cast %56 : vector<4xf32> to vector<1x4xf32>
    %58 = arith.cmpi sle, %44, %40 : i32
    %59 = arith.cmpi sle, %36, %32 : i32
    %60 = arith.ori %58, %59 : i1
    %cst_27 = arith.constant 0.000000e+00 : f32
    %61 = vector.broadcast %cst_27 : f32 to vector<1x4xf32>
    %62 = arith.select %60, %61, %57 : vector<1x4xf32>
    %c2_i32_28 = arith.constant 2 : i32
    %63 = arith.muli %arg0, %c2_i32_28 : i32
    %c1_i32_29 = arith.constant 1 : i32
    %64 = arith.addi %63, %c1_i32_29 : i32
    %65 = arith.index_cast %64 : i32 to index
    %66 = memref.load %arg2[%65] : memref<8xi32, #tpu.memory_space<smem>>
    %c2_i32_30 = arith.constant 2 : i32
    %67 = arith.muli %arg0, %c2_i32_30 : i32
    %c1_i32_31 = arith.constant 1 : i32
    %68 = arith.addi %67, %c1_i32_31 : i32
    %69 = arith.index_cast %68 : i32 to index
    %70 = memref.load %arg3[%69] : memref<8xi32, #tpu.memory_space<smem>>
    %71 = vector.broadcast %66 : i32 to vector<16x1xi32>
    %72 = arith.cmpi sge, %28, %71 : vector<16x1xi32>
    %73 = vector.broadcast %70 : i32 to vector<16x1xi32>
    %74 = arith.cmpi slt, %28, %73 : vector<16x1xi32>
    %75 = arith.andi %72, %74 : vector<16x1xi1>
    %c0_32 = arith.constant 0 : index
    %c0_33 = arith.constant 0 : index
    %c0_34 = arith.constant 0 : index
    %76 = vector.load %arg8[%c0_32, %c0_33, %c0_34] : memref<2x16x4xf32, #tpu.memory_space<vmem>>, vector<1x16x4xf32>
    %77 = vector.shape_cast %76 : vector<1x16x4xf32> to vector<16x4xf32>
    %cst_35 = arith.constant -3.40282347E+38 : f32
    %78 = vector.shape_cast %75 : vector<16x1xi1> to vector<16x1xi1>
    %79 = vector.broadcast %78 : vector<16x1xi1> to vector<16x4xi1>
    %80 = vector.broadcast %cst_35 : f32 to vector<16x4xf32>
    %81 = arith.select %79, %77, %80 : vector<16x4xi1>, vector<16x4xf32>
    %cst_36 = arith.constant dense<0xFF800000> : vector<4xf32>
    %82 = vector.multi_reduction <maximumf>, %81, %cst_36 [0] : vector<16x4xf32> to vector<4xf32>
    %83 = vector.shape_cast %82 : vector<4xf32> to vector<1x4xf32>
    %84 = arith.cmpi sle, %70, %66 : i32
    %85 = arith.cmpi sle, %36, %32 : i32
    %86 = arith.ori %84, %85 : i1
    %cst_37 = arith.constant 0.000000e+00 : f32
    %87 = vector.broadcast %cst_37 : f32 to vector<1x4xf32>
    %88 = arith.select %86, %87, %83 : vector<1x4xf32>
    %89 = tpu.concatenate %62, %88 in 0 : vector<1x4xf32>, vector<1x4xf32> -> vector<2x4xf32>
    %c0_38 = arith.constant 0 : index
    %c0_39 = arith.constant 0 : index
    %c0_40 = arith.constant 0 : index
    %c0_41 = arith.constant 0 : index
    %90 = vector.load %arg7[%c0_38, %c0_39, %c0_40, %c0_41] : memref<1x2x2x4xf32, #tpu.memory_space<vmem>>, vector<1x1x2x4xf32>
    %91 = vector.shape_cast %90 : vector<1x1x2x4xf32> to vector<2x4xf32>
    %92 = vector.shape_cast %89 : vector<2x4xf32> to vector<1x1x2x4xf32>
    tpu.vector_store %arg7[%c0_38, %c0_39, %c0_40, %c0_41], %92 {strides = array<i32>} : memref<1x2x2x4xf32, #tpu.memory_space<vmem>>, vector<1x1x2x4xf32>,
    %c2_i32_42 = arith.constant 2 : i32
    %93 = arith.muli %arg0, %c2_i32_42 : i32
    %c1_i32_43 = arith.constant 1 : i32
    %94 = arith.addi %93, %c1_i32_43 : i32
    %95 = arith.index_cast %94 : i32 to index
    %96 = memref.load %arg4[%95] : memref<8xi32, #tpu.memory_space<smem>>
    %c2_i32_44 = arith.constant 2 : i32
    %97 = arith.muli %arg0, %c2_i32_44 : i32
    %c1_i32_45 = arith.constant 1 : i32
    %98 = arith.addi %97, %c1_i32_45 : i32
    %99 = arith.index_cast %98 : i32 to index
    %100 = memref.load %arg5[%99] : memref<8xi32, #tpu.memory_space<smem>>
    %c2_i32_46 = arith.constant 2 : i32
    %101 = arith.muli %arg0, %c2_i32_46 : i32
    %c0_i32_47 = arith.constant 0 : i32
    %102 = arith.addi %101, %c0_i32_47 : i32
    %103 = arith.index_cast %102 : i32 to index
    %104 = memref.load %arg2[%103] : memref<8xi32, #tpu.memory_space<smem>>
    %c2_i32_48 = arith.constant 2 : i32
    %105 = arith.muli %arg0, %c2_i32_48 : i32
    %c0_i32_49 = arith.constant 0 : i32
    %106 = arith.addi %105, %c0_i32_49 : i32
    %107 = arith.index_cast %106 : i32 to index
    %108 = memref.load %arg3[%107] : memref<8xi32, #tpu.memory_space<smem>>
    %109 = vector.broadcast %104 : i32 to vector<16x1xi32>
    %110 = arith.cmpi sge, %28, %109 : vector<16x1xi32>
    %111 = vector.broadcast %108 : i32 to vector<16x1xi32>
    %112 = arith.cmpi slt, %28, %111 : vector<16x1xi32>
    %113 = arith.andi %110, %112 : vector<16x1xi1>
    %c1_50 = arith.constant 1 : index
    %c0_51 = arith.constant 0 : index
    %c0_52 = arith.constant 0 : index
    %114 = vector.load %arg8[%c1_50, %c0_51, %c0_52] : memref<2x16x4xf32, #tpu.memory_space<vmem>>, vector<1x16x4xf32>
    %115 = vector.shape_cast %114 : vector<1x16x4xf32> to vector<16x4xf32>
    %cst_53 = arith.constant -3.40282347E+38 : f32
    %116 = vector.shape_cast %113 : vector<16x1xi1> to vector<16x1xi1>
    %117 = vector.broadcast %116 : vector<16x1xi1> to vector<16x4xi1>
    %118 = vector.broadcast %cst_53 : f32 to vector<16x4xf32>
    %119 = arith.select %117, %115, %118 : vector<16x4xi1>, vector<16x4xf32>
    %cst_54 = arith.constant dense<0xFF800000> : vector<4xf32>
    %120 = vector.multi_reduction <maximumf>, %119, %cst_54 [0] : vector<16x4xf32> to vector<4xf32>
    %121 = vector.shape_cast %120 : vector<4xf32> to vector<1x4xf32>
    %122 = arith.cmpi sle, %108, %104 : i32
    %123 = arith.cmpi sle, %100, %96 : i32
    %124 = arith.ori %122, %123 : i1
    %cst_55 = arith.constant 0.000000e+00 : f32
    %125 = vector.broadcast %cst_55 : f32 to vector<1x4xf32>
    %126 = arith.select %124, %125, %121 : vector<1x4xf32>
    %c2_i32_56 = arith.constant 2 : i32
    %127 = arith.muli %arg0, %c2_i32_56 : i32
    %c1_i32_57 = arith.constant 1 : i32
    %128 = arith.addi %127, %c1_i32_57 : i32
    %129 = arith.index_cast %128 : i32 to index
    %130 = memref.load %arg2[%129] : memref<8xi32, #tpu.memory_space<smem>>
    %c2_i32_58 = arith.constant 2 : i32
    %131 = arith.muli %arg0, %c2_i32_58 : i32
    %c1_i32_59 = arith.constant 1 : i32
    %132 = arith.addi %131, %c1_i32_59 : i32
    %133 = arith.index_cast %132 : i32 to index
    %134 = memref.load %arg3[%133] : memref<8xi32, #tpu.memory_space<smem>>
    %135 = vector.broadcast %130 : i32 to vector<16x1xi32>
    %136 = arith.cmpi sge, %28, %135 : vector<16x1xi32>
    %137 = vector.broadcast %134 : i32 to vector<16x1xi32>
    %138 = arith.cmpi slt, %28, %137 : vector<16x1xi32>
    %139 = arith.andi %136, %138 : vector<16x1xi1>
    %c1_60 = arith.constant 1 : index
    %c0_61 = arith.constant 0 : index
    %c0_62 = arith.constant 0 : index
    %140 = vector.load %arg8[%c1_60, %c0_61, %c0_62] : memref<2x16x4xf32, #tpu.memory_space<vmem>>, vector<1x16x4xf32>
    %141 = vector.shape_cast %140 : vector<1x16x4xf32> to vector<16x4xf32>
    %cst_63 = arith.constant -3.40282347E+38 : f32
    %142 = vector.shape_cast %139 : vector<16x1xi1> to vector<16x1xi1>
    %143 = vector.broadcast %142 : vector<16x1xi1> to vector<16x4xi1>
    %144 = vector.broadcast %cst_63 : f32 to vector<16x4xf32>
    %145 = arith.select %143, %141, %144 : vector<16x4xi1>, vector<16x4xf32>
    %cst_64 = arith.constant dense<0xFF800000> : vector<4xf32>
    %146 = vector.multi_reduction <maximumf>, %145, %cst_64 [0] : vector<16x4xf32> to vector<4xf32>
    %147 = vector.shape_cast %146 : vector<4xf32> to vector<1x4xf32>
    %148 = arith.cmpi sle, %134, %130 : i32
    %149 = arith.cmpi sle, %100, %96 : i32
    %150 = arith.ori %148, %149 : i1
    %cst_65 = arith.constant 0.000000e+00 : f32
    %151 = vector.broadcast %cst_65 : f32 to vector<1x4xf32>
    %152 = arith.select %150, %151, %147 : vector<1x4xf32>
    %153 = tpu.concatenate %126, %152 in 0 : vector<1x4xf32>, vector<1x4xf32> -> vector<2x4xf32>
    %c0_66 = arith.constant 0 : index
    %c1_67 = arith.constant 1 : index
    %c0_68 = arith.constant 0 : index
    %c0_69 = arith.constant 0 : index
    %154 = vector.load %arg7[%c0_66, %c1_67, %c0_68, %c0_69] : memref<1x2x2x4xf32, #tpu.memory_space<vmem>>, vector<1x1x2x4xf32>
    %155 = vector.shape_cast %154 : vector<1x1x2x4xf32> to vector<2x4xf32>
    %156 = vector.shape_cast %153 : vector<2x4xf32> to vector<1x1x2x4xf32>
    tpu.vector_store %arg7[%c0_66, %c1_67, %c0_68, %c0_69], %156 {strides = array<i32>} : memref<1x2x2x4xf32, #tpu.memory_space<vmem>>, vector<1x1x2x4xf32>,
    return
  }
  func.func @transform_0(%arg0: i32, %arg1: memref<4xi32, #tpu.memory_space<smem>>, %arg2: memref<8xi32, #tpu.memory_space<smem>>, %arg3: memref<8xi32, #tpu.memory_space<smem>>, %arg4: memref<8xi32, #tpu.memory_space<smem>>, %arg5: memref<8xi32, #tpu.memory_space<smem>>) -> (i32, i32, i32, i32) {
    %0 = arith.index_cast %arg0 : i32 to index
    %1 = memref.load %arg1[%0] : memref<4xi32, #tpu.memory_space<smem>>
    %c0_i32 = arith.constant 0 : i32
    %c0_i32_0 = arith.constant 0 : i32
    %c0_i32_1 = arith.constant 0 : i32
    %c0_i32_2 = arith.constant 0 : i32
    return %1, %c0_i32, %c0_i32_0, %c0_i32_1 : i32, i32, i32, i32
  }
  func.func @transform_1(%arg0: i32, %arg1: memref<4xi32, #tpu.memory_space<smem>>, %arg2: memref<8xi32, #tpu.memory_space<smem>>, %arg3: memref<8xi32, #tpu.memory_space<smem>>, %arg4: memref<8xi32, #tpu.memory_space<smem>>, %arg5: memref<8xi32, #tpu.memory_space<smem>>) -> (i32, i32, i32, i32) {
    %c0_i32 = arith.constant 0 : i32
    %c0_i32_0 = arith.constant 0 : i32
    %c0_i32_1 = arith.constant 0 : i32
    %c0_i32_2 = arith.constant 0 : i32
    return %arg0, %c0_i32, %c0_i32_0, %c0_i32_1 : i32, i32, i32, i32
  }
}

</mosaic_0001>

<bundles_post_ra>
// kernel: tpu_custom_call.1
= control target key start
LH: loop header
LB: loop body
LE: loop exit
PB: predicated region body
PF: predicated region fallthrough
CT: control target
= control target key end

     0   :  { %s1021_s0 = inlined_call_operand.vmem [shape: s32[4], index: 0, kind: input, shape index: {}]   ;;  %s1022_s5 = inlined_call_operand.vmem [shape: f32[2,16,16,4], index: 5, kind: input, shape index: {}]   ;;  %s1023_s6 = inlined_call_operand.hbm [shape: f32[4,2,2,4], index: 6, kind: output, shape index: {}]   ;;  %s1024_s1 = inlined_call_operand.vmem [shape: s32[8], index: 1, kind: input, shape index: {}]   ;;  %s1025_s2 = inlined_call_operand.vmem [shape: s32[8], index: 2, kind: input, shape index: {}]   ;;  %s1026_s3 = inlined_call_operand.vmem [shape: s32[8], index: 3, kind: input, shape index: {}]   ;;  %s1027_s4 = inlined_call_operand.vmem [shape: s32[8], index: 4, kind: input, shape index: {}]  }
   0x1   :  { %s11_s23 = sshll.u32 %s1021_s0, 4  ;;  %s15_s26 = sshll.u32 %s1024_s1, 4  ;;  %s12_s23 = int_to_ptr.vmem [resolvable:$true] %s11_s23  ;;  %s16_s26 = int_to_ptr.vmem [resolvable:$true] %s15_s26 }
   0x2   :  { %s508_s27 = scalar_lea.vmem %s12_s23, 16  ;;  %p513_p1 = scmp.lt.s32.totalorder %s12_s23, %s12_s23 }
   0x3   :  { %p509_p0 = scmp.ne.s32.totalorder %s12_s23, %s508_s27  ;;  %p514_p2 = scmp.lt.s32.totalorder %s508_s27, %s508_s27 }
   0x5   :  { %p515_p3 = por %p514_p2, %p513_p1 }
   0x7   :  { %p516_p4 = pnand %p515_p3, %p509_p0 }
   0x9   :  { %519 = shalt.err (!%p516_p4)  }
   0xa   :  { %s650_s28 = smov [#allocation4]   ;;  %s520_s29 = scalar_lea.vmem %s16_s26, 16 }
   0xb   :  { %14 = dma.vmem_to_smem %s12_s23, 16, %s650_s28, [#allocation3] }
   0xc   :  { %p521_p5 = scmp.ne.s32.totalorder %s16_s26, %s520_s29  ;;  %p525_p6 = scmp.lt.s32.totalorder %s16_s26, %s16_s26 }
   0xd   :  { %p526_p7 = scmp.lt.s32.totalorder %s520_s29, %s520_s29 }
   0xf   :  { %p527_p8 = por %p526_p7, %p525_p6 }
  0x11   :  { %p528_p9 = pnand %p527_p8, %p521_p5 }
  0x13   :  { %531 = shalt.err (!%p528_p9)  }
  0x14   :  { %s651_s0 = smov [#allocation5]   ;;  %s19_s7 = sshll.u32 %s1025_s2, 4  ;;  %s20_s7 = int_to_ptr.vmem [resolvable:$true] %s19_s7 }
  0x15   :  { %18 = dma.vmem_to_smem %s16_s26, 16, %s651_s0, [#allocation3] }
  0x16   :  { %s23_s10 = sshll.u32 %s1026_s3, 4  ;;  %s532_s11 = scalar_lea.vmem %s20_s7, 16  ;;  %s24_s10 = int_to_ptr.vmem [resolvable:$true] %s23_s10 }
  0x17   :  { %p533_p10 = scmp.ne.s32.totalorder %s20_s7, %s532_s11  ;;  %p537_p11 = scmp.lt.s32.totalorder %s20_s7, %s20_s7 }
  0x18   :  { %p538_p12 = scmp.lt.s32.totalorder %s532_s11, %s532_s11 }
  0x1a   :  { %p539_p13 = por %p538_p12, %p537_p11 }
  0x1c   :  { %p540_p0 = pnand %p539_p13, %p533_p10 }
  0x1e   :  { %543 = shalt.err (!%p540_p0)  }
  0x1f   :  { %s652_s12 = smov [#allocation6]   ;;  %s544_s13 = scalar_lea.vmem %s24_s10, 16 }
  0x20   :  { %22 = dma.vmem_to_smem %s20_s7, 16, %s652_s12, [#allocation3] }
  0x21   :  { %p545_p1 = scmp.ne.s32.totalorder %s24_s10, %s544_s13  ;;  %p549_p2 = scmp.lt.s32.totalorder %s24_s10, %s24_s10 }
  0x22   :  { %p550_p3 = scmp.lt.s32.totalorder %s544_s13, %s544_s13 }
  0x24   :  { %p551_p4 = por %p550_p3, %p549_p2 }
  0x26   :  { %p552_p5 = pnand %p551_p4, %p545_p1 }
  0x28   :  { %555 = shalt.err (!%p552_p5)  }
  0x29   :  { %s653_s2 = smov [#allocation7]   ;;  %s27_s15 = sshll.u32 %s1027_s4, 4  ;;  %s28_s15 = int_to_ptr.vmem [resolvable:$true] %s27_s15 }
  0x2a   :  { %26 = dma.vmem_to_smem %s24_s10, 16, %s653_s2, [#allocation3] }
  0x2b   :  { %s556_s16 = scalar_lea.vmem %s28_s15, 16  ;;  %p561_p7 = scmp.lt.s32.totalorder %s28_s15, %s28_s15 }
  0x2c   :  { %p557_p6 = scmp.ne.s32.totalorder %s28_s15, %s556_s16  ;;  %p562_p8 = scmp.lt.s32.totalorder %s556_s16, %s556_s16 }
  0x2e   :  { %p563_p9 = por %p562_p8, %p561_p7 }
  0x30   :  { %p564_p10 = pnand %p563_p9, %p557_p6 }
  0x32   :  { %567 = shalt.err (!%p564_p10)  }
  0x33   :  { %s654_s17 = smov [#allocation8]  }
  0x34   :  { %30 = dma.vmem_to_smem %s28_s15, 16, %s654_s17, [#allocation3] }
  0x35   :  { %620 = dma.done.wait [#allocation3], 80 }
  0x36   :  { %621 = vsyncadd [#allocation3], 4294967216 }
  0x37   :  { %32 = sfence }
  0x38   :  { %33 = vsyncpa [#allocation10], 0 }
  0x39   :  { %35 = vsyncpa [#allocation10 + $0x1], 0  ;;  %s709_s18 = smov 0   ;;  %s711_s19 = smov 0  }
  0x3a   :  { %s713_s4 = smov 0   ;;  %s715_s20 = smov 0  }
  0x3b LB: > { %s730_s21 = sadd.s32 4294967295, %s640_s20   ;;  %s427_s22 = sadd.s32 4294967294, %s640_s20   ;;  %s640_s20 = sphi %s715_s20, %s1051_s20   ;;  %s636_s4 = sphi %s713_s4, %s1050_s4   ;;  %s632_s19 = sphi %s711_s19, %s1049_s19   ;;  %s628_s18 = sphi %s709_s18, %s1048_s18  }
  0x3c   : > { %s734_s23 = sadd.s32 1, %s640_s20   ;;  %s76_s24 = sadd.s32 1, %s636_s4 }
  0x3d   : > { %s73_s25 = ssub.s32 %s640_s20, %s734_s23  ;;  %p86_p11 = scmp.ne.s32.totalorder %s636_s4, %s632_s19 }
  0x3e   : > { %p74_p12 = scmp.eq.s32.totalorder %s73_s25, 0  ;;  %p87_p13 = scmp.eq.s32.totalorder %s730_s21, 3 }
  0x3f   : > { %p92_p0 = scmp.ne.s32.totalorder %s632_s19, %s628_s18  ;;  %p93_p1 = scmp.eq.s32.totalorder %s427_s22, 3 }
  0x40   : > { %s745_s26 = scalar_select %p74_p12, %s636_s4, %s76_s24  }
  0x41   : > { %p747_p2 = por %p87_p13, %p86_p11  ;;  %p751_p3 = por %p93_p1, %p92_p0 }
  0x42   : > { %p430_p4 = scmp.ge.s32.totalorder %s640_s20, 1  ;;  %p121_p5 = scmp.lt.s32.totalorder %s640_s20, 5 }
  0x44   : > { %p122_p6 = pnand %p430_p4, %p121_p5 }
  0x45   : > { %s139_s29 = sand.u32 (!%p122_p6), 1, %s632_s19   ;;  %s142_s0 = sld [smem:[#allocation4 + %s730_s21]] (!%p122_p6)  ;;  %vm152_vm0 = vcmask (!%p122_p6), 31744   ;;  %v655_v0 = vmov (!%p122_p6), -3.4028235e+38  }
  0x46   : > { %125 = sbr.rel (%p122_p6) target bundleno = 179 (0xb3), region = 24  ;;  %s431_s1 = sshll.u32 (!%p122_p6), %s139_s29, 2  ;;  %153 = vst.msk [vmem:[#allocation2] sm:$0xff] (!%p122_p6), %vm152_vm0, %v655_v0  ;;  %154 = vst.msk [vmem:[#allocation2 + $0x8] sm:$0xff] (!%p122_p6), %vm152_vm0, %v655_v0 }
  0x47   : > { %s762_s30 = sshll.u32 (!%p122_p6), %s730_s21, 1  ;;  %s773_s13 = scalar_lea.vmem (!%p122_p6), [#allocation9], %s431_s1 }
  0x48   : > { %s150_s7 = sld [smem:[#allocation7 + %s762_s30]] (!%p122_p6)  }
  0x49   : > { %s151_s8 = sld [smem:[#allocation8 + %s762_s30]] (!%p122_p6) }
  0x4b   : > { %p143_p7 = scmp.lt.s32.totalorder (!%p122_p6), %s142_s0, 1 }
  0x4d   : > { %s1053_s0 = smov (!%p143_p7, %s142_s0), 1 }
  0x4e   : > { %s443_s9 = sshll.u32 %s1053_s0, 8 }
  0x4f   : > { %s771_s12 = scalar_lea.vmem %s1022_s5, %s443_s9  ;;  %p397_p8 = scmp.ge.s32.totalorder %s150_s7, %s151_s8 }
  0x50   : > { %s642_s2 = smov (!%p397_p8), %s150_s7  }
  0x51   : > { %398 = sbr.rel (%p397_p8) target bundleno = 98 (0x62), region = 71 }
  0x58 LB: >> { %v161_v1 = vld [vmem:[#allocation2] sm:$0xff]  ;;  %s435_s3 = sshll.u32 %s644_s2, 4  ;;  %v162_v2 = vld [vmem:[#allocation2 + $0x8] sm:$0xff]  ;;  %s158_s2 = sadd.s32 1, %s644_s2   ;;  %s644_s2 = sphi %s642_s2, %s158_s2  }
  0x59   : >> { %s164_s14 = scalar_lea.vmem %s771_s12, %s435_s3  ;;  %p157_p9 = scmp.ge.s32.totalorder %s158_s2, %s151_s8 }
  0x5a   : >> { %v165_v3 = vld [vmem:[%s164_s14] sm:$0xff]  ;;  %v166_v4 = vld [vmem:[%s164_s14 + $0x8] sm:$0xff] }
  0x5b   : >> { %v167_v5 = vmax.f32 %v161_v1, %v165_v3  ;;  %v168_v6 = vmax.f32 %v162_v2, %v166_v4  ;;  %160 = sbr.rel (!%p157_p9) target bundleno = 88 (0x58), region = 77 }
  0x5d   : >> { %169 = vst.msk [vmem:[#allocation2] sm:$0xff] %vm152_vm0, %v167_v5  ;;  %170 = vst.msk [vmem:[#allocation2 + $0x8] sm:$0xff] %vm152_vm0, %v168_v6 }
  0x62 PF: > { %s779_s15 = sadd.s32 1, %s762_s30  ;;  %175 = vst.msk [vmem:[#allocation2 + $0x10] sm:$0xff] %vm152_vm0, %v655_v0  ;;  %176 = vst.msk [vmem:[#allocation2 + $0x18] sm:$0xff] %vm152_vm0, %v655_v0 }
  0x63   : > { %s172_s16 = sld [smem:[#allocation7 + %s779_s15]]  }
  0x64   : > { %s173_s17 = sld [smem:[#allocation8 + %s779_s15]] }
  0x6a   : > { %p402_p10 = scmp.ge.s32.totalorder %s172_s16, %s173_s17 }
  0x6b   : > { %s646_s22 = smov (!%p402_p10), %s172_s16  }
  0x6c   : > { %403 = sbr.rel (%p402_p10) target bundleno = 125 (0x7d), region = 82 }
  0x73 LB: >> { %v183_v7 = vld [vmem:[#allocation2 + $0x10] sm:$0xff]  ;;  %s436_s24 = sshll.u32 %s648_s22, 4  ;;  %v184_v8 = vld [vmem:[#allocation2 + $0x18] sm:$0xff]  ;;  %s180_s22 = sadd.s32 1, %s648_s22   ;;  %s648_s22 = sphi %s646_s22, %s180_s22  }
  0x74   : >> { %s186_s25 = scalar_lea.vmem %s771_s12, %s436_s24  ;;  %p179_p11 = scmp.ge.s32.totalorder %s180_s22, %s173_s17 }
  0x75   : >> { %v187_v9 = vld [vmem:[%s186_s25] sm:$0xff]  ;;  %v188_v10 = vld [vmem:[%s186_s25 + $0x8] sm:$0xff] }
  0x76   : >> { %v189_v11 = vmax.f32 %v183_v7, %v187_v9  ;;  %v190_v12 = vmax.f32 %v184_v8, %v188_v10  ;;  %182 = sbr.rel (!%p179_p11) target bundleno = 115 (0x73), region = 88 }
  0x78   : >> { %191 = vst.msk [vmem:[#allocation2 + $0x10] sm:$0xff] %vm152_vm0, %v189_v11  ;;  %192 = vst.msk [vmem:[#allocation2 + $0x18] sm:$0xff] %vm152_vm0, %v190_v12 }
  0x7d PF: > { %v193_v13 = vlaneseq  ;;  %s789_s0 = sld [smem:[#allocation7 + %s762_s30]]  ;;  %v208_v18 = vld [vmem:[#allocation2] sm:$0xff]  ;;  %v209_v21 = vld [vmem:[#allocation2 + $0x8] sm:$0xff] }
  0x7e   : > { %s792_s1 = sld [smem:[#allocation8 + %s762_s30]] }
  0x7f   : > { %s795_s7 = sld [smem:[#allocation5 + %s762_s30]]  ;;  %v800_v14 = vshrl.u32 %v193_v13, 7  ;;  %v279_v38 = vld [vmem:[#allocation2 + $0x10] sm:$0xff]  ;;  %v280_v41 = vld [vmem:[#allocation2 + $0x18] sm:$0xff] }
  0x80   : > { %s798_s8 = sld [smem:[#allocation6 + %s762_s30]] }
  0x81   : > { %s803_s9 = sld [smem:[#allocation5 + %s779_s15]]  ;;  %v809_v15 = vadd.s32 8, %v800_v14 }
  0x82   : > { %s806_s10 = sld [smem:[#allocation6 + %s779_s15]] }
  0x83   : > { %s812_s11 = sld [smem:[#allocation5 + %s762_s30]] }
  0x84   : > { %s815_s12 = sld [smem:[#allocation6 + %s762_s30]]  ;;  %p226_p13 = scmp.le.s32.totalorder %s792_s1, %s789_s0 }
  0x85   : > { %v200_v16 = vstv %s795_s7  ;;  %s832_s30 = sld [smem:[#allocation5 + %s779_s15]] }
  0x86   : > { %v203_v17 = vstv %s798_s8  ;;  %vm201_vm1 = vcmp.ge.s32.totalorder %v800_v14, %v200_v16  ;;  %vm821_vm2 = vcmp.ge.s32.totalorder %v809_v15, %v200_v16  ;;  %s835_s2 = sld [smem:[#allocation6 + %s779_s15]]  ;;  %p225_p12 = scmp.le.s32.totalorder %s798_s8, %s795_s7 }
  0x87   : > { %vm204_vm3 = vcmp.lt.s32.totalorder %v800_v14, %v203_v17  ;;  %vm827_vm4 = vcmp.lt.s32.totalorder %v809_v15, %v203_v17  ;;  %v234_v22 = vstv %s803_s9  ;;  %s859_s3 = sld [smem:[#allocation7 + %s779_s15]]  ;;  %s444_s7 = sshll.u32 %s730_s21, 6 }
  0x88   : > { %vm206_vm5 = vmand %vm201_vm1, %vm204_vm3  ;;  %v237_v23 = vstv %s806_s10  ;;  %vm235_vm7 = vcmp.ge.s32.totalorder %v800_v14, %v234_v22  ;;  %vm849_vm8 = vcmp.ge.s32.totalorder %v809_v15, %v234_v22  ;;  %p257_p0 = scmp.le.s32.totalorder %s806_s10, %s803_s9  ;;  %s862_s14 = sld [smem:[#allocation8 + %s779_s15]] }
  0x89   : > { %vm207_vm6 = vmand %vm821_vm2, %vm827_vm4  ;;  %v214_v24 = vsel %vm206_vm5, %v208_v18, -3.4028235e+38  ;;  %vm238_vm9 = vcmp.lt.s32.totalorder %v800_v14, %v237_v23  ;;  %vm239_vm10 = vcmp.lt.s32.totalorder %v809_v15, %v237_v23  ;;  %v271_v28 = vstv %s812_s11  ;;  %p874_p1 = por %p226_p13, %p225_p12  ;;  %s351_s8 = sshll.u32 %s773_s13, 4  ;;  %s973_s8 = int_to_ptr.vmem [resolvable:$true] %s351_s8 }
  0x8a   : > { %v215_v26 = vsel %vm207_vm6, %v209_v21, -3.4028235e+38  ;;  %v216_v27 = vsel %vm152_vm0, %v214_v24, -inf  ;;  %vm240_vm11 = vmand %vm235_vm7, %vm238_vm9  ;;  %vm880_vm13 = vcmp.ge.s32.totalorder %v800_v14, %v271_v28  ;;  %p891_p4 = por %p257_p0, %p226_p13  ;;  %vm896_vm14 = vcmp.ge.s32.totalorder %v809_v15, %v271_v28  ;;  %p296_p5 = scmp.le.s32.totalorder %s815_s12, %s812_s11 }
  0x8b   : > { %v217_v29 = vsel %vm152_vm0, %v215_v26, -inf  ;;  %vm241_vm12 = vmand %vm849_vm8, %vm239_vm10  ;;  %v246_v30 = vsel %vm240_vm11, %v208_v18, -3.4028235e+38  ;;  %v274_v37 = vstv %s815_s12  ;;  %v305_v42 = vstv %s832_s30  ;;  %s228_s17 = scalar_select %p874_p1, 1, 0 }
  0x8c   : > { %v218_v31 = vmax.f32 %v216_v27, %v217_v29  ;;  %v247_v32 = vsel %vm241_vm12, %v209_v21, -3.4028235e+38  ;;  %v248_v33 = vsel %vm152_vm0, %v246_v30, -inf  ;;  %vm275_vm15 = vcmp.lt.s32.totalorder %v800_v14, %v274_v37  ;;  %s259_s22 = scalar_select %p891_p4, 1, 0 }
  0x8d   : > { %v249_v35 = vsel %vm152_vm0, %v247_v32, -inf  ;;  %vm276_vm1 = vcmp.lt.s32.totalorder %v809_v15, %v274_v37  ;;  %vm277_vm2 = vmand %vm880_vm13, %vm275_vm15  ;;  %v308_v46 = vstv %s835_s2  ;;  %vm915_vm4 = vcmp.ge.s32.totalorder %v800_v14, %v305_v42  ;;  %p328_p7 = scmp.le.s32.totalorder %s835_s2, %s832_s30  ;;  %s971_s11 = scalar_lea.hbm %s1023_s6, %s444_s7 }
  0x8e   : > { %v219_v39 = vrot.slane %v218_v31, 4  ;;  %v250_v40 = vmax.f32 %v248_v33, %v249_v35  ;;  %vm278_vm3 = vmand %vm896_vm14, %vm276_vm1  ;;  %v285_v45 = vsel %vm277_vm2, %v279_v38, -3.4028235e+38  ;;  %p297_p6 = scmp.le.s32.totalorder %s862_s14, %s859_s3  ;;  %vm925_vm5 = vcmp.ge.s32.totalorder %v809_v15, %v305_v42  ;;  %s980_s21 = scalar_lea.sflag [#allocation10], %s139_s29 }
  0x8f   : > { %v286_v47 = vsel %vm278_vm3, %v280_v41, -3.4028235e+38  ;;  %v287_v48 = vsel %vm152_vm0, %v285_v45, -inf  ;;  %vm309_vm6 = vcmp.lt.s32.totalorder %v800_v14, %v308_v46  ;;  %vm310_vm7 = vcmp.lt.s32.totalorder %v809_v15, %v308_v46  ;;  %s568_s12 = scalar_lea.vmem %s973_s8, 64  ;;  %s656_s30 = smov [#allocation9]  }
  0x90   : > { %v220_v43 = vmax.f32 %v218_v31, %v219_v39  ;;  %v251_v44 = vrot.slane %v250_v40, 4  ;;  %v288_v52 = vsel %vm152_vm0, %v286_v47, -inf  ;;  %v229_v56 = vstv %s228_s17  ;;  %vm311_vm8 = vmand %vm915_vm4, %vm309_vm6  ;;  %p943_p8 = por %p297_p6, %p296_p5  ;;  %p955_p9 = por %p328_p7, %p297_p6 }
  0x91   : > { %v289_v54 = vmax.f32 %v287_v48, %v288_v52  ;;  %v260_v58 = vstv %s259_s22  ;;  %vm312_vm9 = vmand %vm925_vm5, %vm310_vm7  ;;  %v317_v60 = vsel %vm311_vm8, %v279_v38, -3.4028235e+38  ;;  %vm230_vm10 = vcmp.eq.s32.totalorder %v229_v56, 1  ;;  %p569_p10 = scmp.ne.s32.totalorder %s973_s8, %s568_s12  ;;  %s572_s2 = sshll.u32 %s656_s30, 4  ;;  %s573_s2 = int_to_ptr.vmem [resolvable:$false] %s572_s2 }
  0x92   : > { %v221_v50 = vrot.slane %v220_v43, 2  ;;  %v252_v51 = vmax.f32 %v250_v40, %v251_v44  ;;  %v318_v63 = vsel %vm312_vm9, %v280_v41, -3.4028235e+38  ;;  %v319_v0 = vsel %vm152_vm0, %v317_v60, -inf  ;;  %s299_s0 = scalar_select %p943_p8, 1, 0 }
  0x93   : > { %v290_v59 = vrot.slane %v289_v54, 4  ;;  %v320_v2 = vsel %vm152_vm0, %v318_v63, -inf  ;;  %vm261_vm11 = vcmp.eq.s32.totalorder %v260_v58, 1  ;;  %vm263_vm12 = vcmask 1040384   ;;  %s330_s1 = scalar_select %p955_p9, 1, 0 }
  0x94   : > { %v222_v55 = vmax.f32 %v220_v43, %v221_v50  ;;  %v253_v57 = vrot.slane %v252_v51, 2  ;;  %v321_v5 = vmax.f32 %v319_v0, %v320_v2  ;;  %vm265_vm0 = vcmask 25600   ;;  %p570_p11 = pnand %p569_p10, %p747_p2  ;;  %s574_s3 = scalar_lea.vmem %s573_s2, 128 }
  0x95   : > { %v291_v1 = vmax.f32 %v289_v54, %v290_v59  ;;  %v300_v15 = vstv %s299_s0  ;;  %v331_v19 = vstv %s330_s1  ;;  %p575_p13 = scmp.lt.s32.totalorder %s973_s8, %s573_s2  ;;  %p576_p0 = scmp.lt.s32.totalorder %s574_s3, %s568_s12 }
  0x96   : > { %v223_v61 = vrot.slane %v222_v55, 1  ;;  %v254_v62 = vmax.f32 %v252_v51, %v253_v57  ;;  %v322_v9 = vrot.slane %v321_v5, 4  ;;  %vm301_vm13 = vcmp.eq.s32.totalorder %v300_v15, 1  ;;  %p571_p12 = pneg %p570_p11 }
  0x97   : > { %v292_v6 = vrot.slane %v291_v1, 2  ;;  %vm332_vm14 = vcmp.eq.s32.totalorder %v331_v19, 1  ;;  %p577_p1 = por %p576_p0, %p575_p13 }
  0x98   : > { %v224_v3 = vmax.f32 %v222_v55, %v223_v61  ;;  %v255_v4 = vrot.slane %v254_v62, 1  ;;  %v323_v12 = vmax.f32 %v321_v5, %v322_v9 }
  0x99   : > { %v293_v10 = vmax.f32 %v291_v1, %v292_v6  ;;  %p578_p4 = pnand %p577_p1, %p571_p12 }
  0x9a   : > { %v231_v7 = vsel %vm230_vm10, 0.0, %v224_v3  ;;  %v256_v8 = vmax.f32 %v254_v62, %v255_v4  ;;  %v324_v16 = vrot.slane %v323_v12, 2 }
  0x9b   : > { %v294_v14 = vrot.slane %v293_v10, 1 }
  0x9c   : > { %v262_v11 = vsel %vm261_vm11, 0.0, %v256_v8  ;;  %v325_v18 = vmax.f32 %v323_v12, %v324_v16 }
  0x9d   : > { %v264_v13 = vsel %vm263_vm12, %v231_v7, %v262_v11  ;;  %v295_v17 = vmax.f32 %v293_v10, %v294_v14 }
  0x9e   : > { %266 = vst.msk [vmem:[%s773_s13] sm:$0x3] %vm265_vm0, %v264_v13  ;;  %v326_v20 = vrot.slane %v325_v18, 1 }
  0x9f   : > { %v302_v21 = vsel %vm301_vm13, 0.0, %v295_v17 }
  0xa0   : > { %v327_v22 = vmax.f32 %v325_v18, %v326_v20 }
  0xa2   : > { %v333_v23 = vsel %vm332_vm14, 0.0, %v327_v22 }
  0xa3   : > { %v334_v24 = vsel %vm263_vm12, %v302_v21, %v333_v23 }
  0xa4   : > { %437 = vst.msk [vmem:[%s773_s13 + $0x2] sm:$0x3] %vm265_vm0, %v334_v24 }
  0xa5   : > { %581 = shalt.err (!%p578_p4)
}
  0xa6   : > { %s582_s29 = scalar_lea.hbm %s971_s11, 64  ;;  %s586_s16 = scalar_lea.hbm %s1023_s6, 256 }
  0xa7   : > { %p583_p5 = scmp.ne.s32.totalorder %s971_s11, %s582_s29  ;;  %p587_p8 = scmp.lt.u32.totalorder %s971_s11, %s1023_s6 }
  0xa8   : > { %p588_p9 = scmp.lt.u32.totalorder %s586_s16, %s582_s29  ;;  %p590_p11 = scmp.lt.u32.totalorder %s582_s29, %s971_s11 }
  0xa9   : > { %p584_p6 = pnand %p583_p5, %p747_p2 }
  0xaa   : > { %p589_p10 = por %p588_p9, %p587_p8 }
  0xab   : > { %p585_p7 = pneg %p584_p6 }
  0xac   : > { %p591_p12 = por %p590_p11, %p589_p10 }
  0xae   : > { %p592_p13 = pnand %p591_p12, %p585_p7 }
  0xb0   : > { %595 = shalt.err (!%p592_p13)
}
  0xb1   : > { %s657_s22 = smov 32   ;;  %s658_s24 = smov 2  }
  0xb2   : > { %445 = dma.vmem_to_hbm [thread:$0]  (%p747_p2), %s973_s8, 64, %s971_s11, %s980_s21, %s657_s22, %s657_s22, %s658_s24  }
  0xb3 PF: > { %p451_p0 = scmp.ge.s32.totalorder %s640_s20, 2  ;;  %s366_s25 = sand.u32 1, %s628_s18  }
  0xb4   : > { %s367_s0 = scalar_lea.sflag [#allocation10], %s366_s25 }
  0xb5   : > { %p448_p1 = pnand %p451_p0, %p751_p3 }
  0xb7   : > { %623 = dma.done.wait (!%p448_p1), %s367_s0, 64  }
  0xb8   : > { %625 = vsyncadd (!%p448_p1), %s367_s0, 4294967232  ;;  %p38_p4 = scmp.ge.s32.totalorder %s734_s23, 6   ;;  %s1048_s18 = smov %s632_s19 }
  0xb9   : > { %s1049_s19 = smov %s636_s4  ;;  %s1050_s4 = smov %s745_s26 }
  0xba   : > { %s1051_s20 = smov %s734_s23  ;;  %40 = sbr.rel (!%p38_p4) target bundleno = 59 (0x3b), region = 99 }
  0xc1   :  { %372 = vsyncpa [#allocation10], 1 }
  0xc2   :  { %374 = vsyncpa [#allocation10 + $0x1], 1 }

</bundles_post_ra>
